<compile_context>
chip_gen: v7x
topology: tpu7x:2x2x1
jax: 0.10.0
libtpu: 0.0.40
codegen_flags: <defaults>
</compile_context>

<pallas_src>
import numpy as np
import jax
import jax.numpy as jnp
from jax.experimental import pallas as pl
from jax.experimental.pallas import tpu as pltpu

N_JOINTS = 16           # blocks = [0, 10, 13, 16]  =>  n = 16
IN_FEATURES = 4
OUT_FEATURES = 8
BATCH = 2
NEG_BIG = -9000000000000000.0  # same constant the torch module uses


# ----------------------------------------------------------------------------- kernel
def sem_graph_conv_kernel(x_ref, w_ref, b_ref, out_ref):
    # x_ref:   (tile_b, n*Fin)   flattened input, column index j*Fin + f
    # w_ref:   (n*Fin, n*Fout)   fused weight (basis @ block-linear @ basis.T @ diag(d)),
    #                            columns already permuted to index j*Fout + o
    # b_ref:   (1, n*Fout)       bias[o] repeated per joint (index j*Fout + o)
    # out_ref: (tile_b, n*Fout)  final layout -> reshape to (batch, n, Fout) outside
    out_ref[...] = (jnp.dot(x_ref[...], w_ref[...],
                            preferred_element_type=jnp.float32)
                    + b_ref[...])


# ----------------------------------------------------------------------------- init
def build_fused_params(B, W_e, W_2, W_3, bias, adj, e_edge,
                       n=N_JOINTS, f_in=IN_FEATURES, f_out=OUT_FEATURES):
    """One-time host-side parameter rearrangement (pure parameter math, no input deps).

    Fuses:  x -> irrep (B)  ->  block linears (W_e, W_2, W_3)  ->  back-project (B.T)
            ->  scale row j by d[j] = diag(softmax(masked adj))  ->  column permute
    into a single (n*Fin, n*Fout) matrix plus a flattened bias.
    """
    B_np = np.asarray(B, np.float32)

    # stage 1: Bbig[(j*Fin+f), (f'*n+j')] = B[j, j'] * delta(f, f')
    Bbig = (np.eye(f_in, dtype=np.float32)[None, :, :, None]
            * B_np[:, None, None, :]).reshape(n * f_in, f_in * n)

    # stage 2: block-diagonal irrep linear (W_e on 10-block, W_2 / W_3 on 3-blocks)
    Wbig4 = np.zeros((f_out, n, f_in, n), np.float32)
    Wbig4[:, 0:10, :, 0:10] = np.asarray(W_e, np.float32).reshape(f_out, 10, f_in, 10)
    Wbig4[:, 10:13, :, 10:13] = np.asarray(W_2, np.float32).reshape(f_out, 3, f_in, 3)
    Wbig4[:, 13:16, :, 13:16] = np.asarray(W_3, np.float32).reshape(f_out, 3, f_in, 3)
    WbigT = Wbig4.reshape(f_out * n, f_in * n).T                    # (Fin*n, Fout*n)

    # stage 3: Cbig[(o'*n+j'), (o*n+j)] = delta(o', o) * B[j, j']
    Cbig = (np.eye(f_out, dtype=np.float32)[:, None, :, None]
            * B_np.T[None, :, None, :]).reshape(f_out * n, f_out * n)

    # graph part: masked adjacency logits -> row softmax -> keep diagonal d[j]
    adj_np = np.asarray(adj, np.float32)
    adj_logits = np.full((n, n), NEG_BIG, np.float32)
    rows, cols = np.nonzero(adj_np > 0)        # row-major, matches torch adj[m] = e
    adj_logits[rows, cols] = np.asarray(e_edge, np.float32).reshape(-1)
    rowmax = adj_logits.max(axis=1, keepdims=True)
    ex = np.exp(adj_logits - rowmax)
    sm = ex / ex.sum(axis=1, keepdims=True)
    d = np.diag(sm).astype(np.float32)         # d[j] = softmax(adj[j, :])[j]

    # fuse: one (n*Fin, Fout*n) weight, columns indexed o*n + j, scaled by d[j]
    Mfused = Bbig @ WbigT @ Cbig
    Mfused = Mfused * np.tile(d, f_out)[None, :]

    # permute columns o*n+j -> j*Fout+o so the kernel output is already (batch, n*Fout)
    Mfused = (Mfused.reshape(n * f_in, f_out, n)
                    .transpose(0, 2, 1)
                    .reshape(n * f_in, n * f_out))
    bias_flat = np.tile(np.asarray(bias, np.float32), n)[None, :]   # (1, n*Fout)

    return jnp.asarray(Mfused), jnp.asarray(bias_flat)


# ----------------------------------------------------------------------------- apply
def _round_up(x, m):
    return (x + m - 1) // m * m


@jax.jit
def sem_graph_conv_apply(x, w_fused, bias_flat):
    """x: (batch, n, Fin) -> (batch, n, Fout). One fused matmul + bias kernel."""
    batch, n, f_in = x.shape
    n_out = w_fused.shape[1]
    f_out = n_out // n

    x2d = x.reshape(batch, n * f_in).astype(jnp.float32)

    # pad rows to a sublane multiple: unmasked vector stores, fuller MXU rows
    tile_b = 8
    padded = _round_up(max(batch, tile_b), tile_b)
    if padded != batch:
        x2d = jnp.pad(x2d, ((0, padded - batch), (0, 0)))

    out2d = pl.pallas_call(
        sem_graph_conv_kernel,
        out_shape=jax.ShapeDtypeStruct((padded, n_out), jnp.float32),
        grid=(padded // tile_b,),
        in_specs=[
            pl.BlockSpec((tile_b, n * f_in), lambda i: (i, 0)),
            pl.BlockSpec((n * f_in, n_out), lambda i: (0, 0)),   # weight stays resident
            pl.BlockSpec((1, n_out), lambda i: (0, 0)),
        ],
        out_specs=pl.BlockSpec((tile_b, n_out), lambda i: (i, 0)),
        compiler_params=pltpu.CompilerParams(dimension_semantics=("parallel",)),
    )(x2d, w_fused, bias_flat)

    # columns are already j*Fout + o -> plain reshape, no transpose
    return out2d[:batch].reshape(batch, n, f_out)


# ----------------------------------------------------------------------------- reference
def reference_forward(x, B, W_e, W_2, W_3, bias, adj, e_edge):
    """Literal JAX port of the PyTorch forward (pt=False, gc_flag & ew_flag)."""
    batch = x.shape[0]
    n = adj.shape[0]
    irrep = jnp.matmul(jnp.transpose(x, (2, 0, 1)), B)          # (Fin, B, n)
    irrep = jnp.transpose(irrep, (1, 0, 2))                      # (B, Fin, n)
    out_e = (irrep[:, :, :10].reshape(batch, -1) @ W_e.T).reshape(batch, -1, 10)
    out_2 = (irrep[:, :, 10:13].reshape(batch, -1) @ W_2.T).reshape(batch, -1, 3)
    out_3 = (irrep[:, :, 13:].reshape(batch, -1) @ W_3.T).reshape(batch, -1, 3)
    out_irrep = jnp.concatenate([out_e, out_2, out_3], axis=2)   # (B, Fout, n)
    h = jnp.matmul(out_irrep, B.T)                               # (B, Fout, n)
    h = jnp.transpose(h, (0, 2, 1))                              # (B, n, Fout)

    adj_np = np.asarray(adj, np.float32)
    logits = np.full((n, n), NEG_BIG, np.float32)
    rows, cols = np.nonzero(adj_np > 0)
    logits[rows, cols] = np.asarray(e_edge, np.float32).reshape(-1)
    sm = jax.nn.softmax(jnp.asarray(logits), axis=1)
    M = jnp.eye(n, dtype=jnp.float32)
    output = jnp.matmul(sm * M, h)
    return output + bias[None, None, :]


# ----------------------------------------------------------------------------- main
if __name__ == "__main__":
    key = jax.random.PRNGKey(0)
    k_x, k_b, k_we, k_w2, k_w3, k_bias, k_e = jax.random.split(key, 7)

    n, f_in, f_out = N_JOINTS, IN_FEATURES, OUT_FEATURES

    # deterministic synthetic parameters (shapes follow the module's __init__)
    x = jax.random.normal(k_x, (BATCH, n, f_in), dtype=jnp.float32)
    Bbasis = jax.random.normal(k_b, (n, n), dtype=jnp.float32) * 0.25
    W_e = jax.random.normal(k_we, (f_out * 10, f_in * 10), dtype=jnp.float32) * 0.1
    W_2 = jax.random.normal(k_w2, (f_out * 3, f_in * 3), dtype=jnp.float32) * 0.1
    W_3 = jax.random.normal(k_w3, (f_out * 3, f_in * 3), dtype=jnp.float32) * 0.1
    bias = jax.random.uniform(k_bias, (f_out,), dtype=jnp.float32,
                              minval=-1.0 / np.sqrt(f_out), maxval=1.0 / np.sqrt(f_out))

    # skeleton-like adjacency: self-loops + ring
    adj_np = np.eye(n, dtype=np.float32)
    for i in range(n):
        adj_np[i, (i + 1) % n] = 1.0
        adj_np[(i + 1) % n, i] = 1.0
    n_edges = int((adj_np > 0).sum())
    e_edge = jax.random.uniform(k_e, (1, n_edges), dtype=jnp.float32,
                                minval=0.5, maxval=1.5)

    # one-time parameter fusion (init), then jitted apply
    w_fused, bias_flat = build_fused_params(Bbasis, W_e, W_2, W_3, bias,
                                            jnp.asarray(adj_np), e_edge)
    out_kernel = sem_graph_conv_apply(x, w_fused, bias_flat)
    out_kernel = jax.block_until_ready(out_kernel)

    out_ref = reference_forward(x, Bbasis, W_e, W_2, W_3, bias,
                                jnp.asarray(adj_np), e_edge)
    out_ref = jax.block_until_ready(out_ref)

    assert out_kernel.shape == (BATCH, n, f_out), out_kernel.shape
    np.testing.assert_allclose(np.asarray(out_kernel), np.asarray(out_ref),
                               rtol=1e-4, atol=1e-4)
    print("KERNEL_OK")
</pallas_src>

<mosaic_0001>
module attributes {stable_mosaic.version = 11 : i64} {
  func.func @sem_graph_conv_kernel(%arg0: i32, %arg1: memref<8x64xf32, #tpu.memory_space<vmem>>, %arg2: memref<64x128xf32, #tpu.memory_space<vmem>>, %arg3: memref<1x128xf32, #tpu.memory_space<vmem>>, %arg4: memref<8x128xf32, #tpu.memory_space<vmem>>) attributes {dimension_semantics = [#tpu.dimension_semantics<parallel>], iteration_bounds = array<i64: 1>, scalar_prefetch = 0 : i64, scratch_operands = 0 : i64, tpu.core_type = #tpu.core_type<tc>, window_params = [{transform_indices = @transform_0, window_bounds = array<i64: 8, 64>}, {pipeline_mode = #tpu.pipeline_mode<synchronous>, transform_indices = @transform_1, window_bounds = array<i64: 64, 128>}, {pipeline_mode = #tpu.pipeline_mode<synchronous>, transform_indices = @transform_2, window_bounds = array<i64: 1, 128>}, {transform_indices = @transform_3, window_bounds = array<i64: 8, 128>}]} {
    %c0 = arith.constant 0 : index
    %c0_0 = arith.constant 0 : index
    %0 = vector.load %arg1[%c0, %c0_0] : memref<8x64xf32, #tpu.memory_space<vmem>>, vector<8x64xf32>
    %c0_1 = arith.constant 0 : index
    %c0_2 = arith.constant 0 : index
    %1 = vector.load %arg2[%c0_1, %c0_2] : memref<64x128xf32, #tpu.memory_space<vmem>>, vector<64x128xf32>
    %cst = arith.constant dense<0.000000e+00> : vector<8x128xf32>
    %2 = tpu.matmul %0, %1, %cst {dimension_numbers = #tpu.dot_dimension_numbers<[1], [0], [0], [1], [0, 0, 1, 1], [], []>} : vector<8x64xf32>, vector<64x128xf32>, vector<8x128xf32> -> vector<8x128xf32>
    %c0_3 = arith.constant 0 : index
    %c0_4 = arith.constant 0 : index
    %3 = vector.load %arg3[%c0_3, %c0_4] : memref<1x128xf32, #tpu.memory_space<vmem>>, vector<1x128xf32>
    %4 = vector.broadcast %3 : vector<1x128xf32> to vector<8x128xf32>
    %5 = arith.addf %2, %4 : vector<8x128xf32>
    %c0_5 = arith.constant 0 : index
    %c0_6 = arith.constant 0 : index
    %6 = vector.load %arg4[%c0_5, %c0_6] : memref<8x128xf32, #tpu.memory_space<vmem>>, vector<8x128xf32>
    tpu.vector_store %arg4[%c0_5, %c0_6], %5 {strides = array<i32>} : memref<8x128xf32, #tpu.memory_space<vmem>>, vector<8x128xf32>,
    return
  }
  func.func @transform_0(%arg0: i32) -> (i32, i32) {
    %c0_i32 = arith.constant 0 : i32
    %c0_i32_0 = arith.constant 0 : i32
    return %arg0, %c0_i32 : i32, i32
  }
  func.func @transform_1(%arg0: i32) -> (i32, i32) {
    %c0_i32 = arith.constant 0 : i32
    %c0_i32_0 = arith.constant 0 : i32
    %c0_i32_1 = arith.constant 0 : i32
    return %c0_i32, %c0_i32_0 : i32, i32
  }
  func.func @transform_2(%arg0: i32) -> (i32, i32) {
    %c0_i32 = arith.constant 0 : i32
    %c0_i32_0 = arith.constant 0 : i32
    %c0_i32_1 = arith.constant 0 : i32
    return %c0_i32, %c0_i32_0 : i32, i32
  }
  func.func @transform_3(%arg0: i32) -> (i32, i32) {
    %c0_i32 = arith.constant 0 : i32
    %c0_i32_0 = arith.constant 0 : i32
    return %arg0, %c0_i32 : i32, i32
  }
}

</mosaic_0001>

<bundles_post_ra>
// kernel: sem_graph_conv_apply.1
= control target key start
LH: loop header
LB: loop body
LE: loop exit
PB: predicated region body
PF: predicated region fallthrough
CT: control target
= control target key end

     0   :  { %v154_v0 = vmov 0.0|0.0   ;;  %vm155_vm0 = vmmov 0   ;;  %v156_v4 = vmov 0.0   ;;  %vm30_vm1 = vcmask 523264   ;;  %s210_s1 = inlined_call_operand.vmem [shape: f32[64,128], index: 1, kind: input, shape index: {}]   ;;  %s211_s0 = inlined_call_operand.vmem [shape: f32[8,64], index: 0, kind: input, shape index: {}]   ;;  %s212_s2 = inlined_call_operand.vmem [shape: f32[1,128], index: 2, kind: input, shape index: {}]   ;;  %s213_s3 = inlined_call_operand.vmem [shape: f32[8,128], index: 3, kind: output, shape index: {}]  }
   0x1   :  { %139 = vmatprep.subr.bf16.mxu0 %v154_v0  ;;  %v15_v1 = vld [vmem:[%s210_s1] sm:$0xff]  ;;  %v16_v2 = vld [vmem:[%s210_s1 + $0x8] sm:$0xff]  ;;  %v17_v3 = vld [vmem:[%s210_s1 + $0x10] sm:$0xff]  ;;  %136 = vmatprep.mubr.msk.f32.mxu0 %vm155_vm0, %v156_v4 }
   0x2   :  { %v140_v5 = vpack.c.bf16 %v16_v2, %v15_v1  ;;  %v18_v6 = vld [vmem:[%s210_s1 + $0x18] sm:$0xff]  ;;  %v19_v8 = vld [vmem:[%s210_s1 + $0x20] sm:$0xff]  ;;  %v20_v9 = vld [vmem:[%s210_s1 + $0x28] sm:$0xff] }
   0x3   :  { %v143_v7 = vpack.c.bf16 %v18_v6, %v17_v3  ;;  %v146_v10 = vpack.c.bf16 %v20_v9, %v19_v8  ;;  %v21_v11 = vld [vmem:[%s210_s1 + $0x30] sm:$0xff]  ;;  %v22_v12 = vld [vmem:[%s210_s1 + $0x38] sm:$0xff]  ;;  %v14_v14 = vld [vmem:[%s211_s0] sm:$0xff] }
   0x4   :  { %141 = vmatpush3.bf16.msra.mxu0 %v140_v5  ;;  %v149_v13 = vpack.c.bf16 %v22_v12, %v21_v11  ;;  %v109_v15 = vld [vmem:[%s212_s2] ss:$0 sm:$0xff] }
   0x5   :  { %142 = vmatprep.subr.bf16.mxu0 %v154_v0 }
   0x8   :  { %144 = vmatpush3.bf16.msra.mxu0 %v143_v7 }
   0x9   :  { %145 = vmatprep.subr.bf16.mxu0 %v154_v0 }
   0xc   :  { %147 = vmatpush3.bf16.msra.mxu0 %v146_v10 }
   0xd   :  { %148 = vmatprep.subr.bf16.mxu0 %v154_v0 }
  0x10   :  { %150 = vmatpush3.bf16.msra.mxu0 %v149_v13 }
  0x13   :  { %137 = vmatmul.mubr.msk.f32.vlgmr.msra.gmra.mrb[0].mxu0 %vm30_vm1, %v14_v14 }
  0xe6   :  { %v100_v16 = vpop.f32.mrb[0].mxu0 }
  0xe7   :  { %v101_v17 = vadd.f32 %v109_v15, %v100_v16  ;;  %v138_v18 = vpop.f32.mrb[1].mxu0 }
  0xe9   :  { %104 = vst [vmem:[%s213_s3] sm:$0xff] %v101_v17 }

</bundles_post_ra>
